<compile_context>
chip_gen: v5e
topology: v5e:2x2
jax: 0.10.0
libtpu: 0.0.40
codegen_flags: <defaults>
</compile_context>

<pallas_src>
import functools

import jax
import jax.numpy as jnp
from jax.experimental import pallas as pl
from jax.experimental.pallas import tpu as pltpu

_LANES = 128
_SUBLANES = 8
_TILE_ELEMS = _SUBLANES * _LANES  # 1024: (8, 128) f32 tile granularity


def _quant_symmetric_kernel(max_ref, x_ref, o_ref, *, scale, qmin, qmax):
    # max_ref lives in SMEM (scalar prefetch); x_ref / o_ref are VMEM tiles.
    step = 2.0 * max_ref[0] * scale          # scalar path
    xq = jnp.round(x_ref[...] / step)        # same rounding as round(x/step)
    xq = jnp.clip(xq, qmin, qmax)
    o_ref[...] = xq * step


def quant_symmetric(x, max_val, num_bits, *, tile_m=8192):
    """Pallas implementation of QuantSymmetric.forward(x, max).

    x:        float32 array of any shape (e.g. NCHW activations).
    max_val:  scalar (python float or 0-d/1-d jax array) per-tensor max.
    num_bits: quantization bit width.
    tile_m:   rows (of 128 lanes) per block; multiple of 8, default 8192
              (4 MiB f32 blocks, ~16 MiB double-buffered pipeline footprint).
    """
    levels = 2 ** num_bits
    scale = 1.0 / (levels - 1)
    qmin = -levels / 2
    qmax = levels / 2 - 1

    orig_shape = x.shape
    total = x.size

    # Pad only to the (8, 128) tile granularity: <= 1023 extra elements, and
    # zero-cost (no pad, no slice) whenever total is already a multiple of 1024.
    padded_total = ((total + _TILE_ELEMS - 1) // _TILE_ELEMS) * _TILE_ELEMS
    rows = padded_total // _LANES            # multiple of 8

    x_flat = x.reshape(-1)
    if padded_total != total:
        x_flat = jnp.pad(x_flat, (0, padded_total - total))
    x2d = x_flat.reshape(rows, _LANES)

    # Clamp the tile to the data size; keep it a multiple of 8 sublanes.
    tm = max(_SUBLANES, min(tile_m, rows))
    tm -= tm % _SUBLANES
    # Ragged last block is fine: OOB reads are padded, OOB writes are masked.
    grid_m = pl.cdiv(rows, tm)

    # Keep max on device (no float() host round-trip).
    max_arr = jnp.asarray(max_val, dtype=jnp.float32).reshape(1)

    kernel = functools.partial(
        _quant_symmetric_kernel, scale=scale, qmin=qmin, qmax=qmax
    )

    out2d = pl.pallas_call(
        kernel,
        out_shape=jax.ShapeDtypeStruct((rows, _LANES), x.dtype),
        grid_spec=pltpu.PrefetchScalarGridSpec(
            num_scalar_prefetch=1,                   # max_val -> SMEM
            grid=(grid_m,),
            in_specs=[
                pl.BlockSpec((tm, _LANES), lambda i, max_ref: (i, 0)),
            ],
            out_specs=pl.BlockSpec((tm, _LANES), lambda i, max_ref: (i, 0)),
        ),
        compiler_params=pltpu.CompilerParams(
            dimension_semantics=("parallel",),       # shard tiles across TCs on v7x
            vmem_limit_bytes=48 * 1024 * 1024,       # > v5e 16 MiB default, < v7x 64 MiB physical
        ),
    )(max_arr, x2d)

    out_flat = out2d.reshape(-1)
    if padded_total != total:
        out_flat = out_flat[:total]
    return out_flat.reshape(orig_shape)


def quant_symmetric_ref(x, max_val, num_bits):
    """Pure-JAX reference (mirrors the PyTorch module exactly)."""
    levels = 2 ** num_bits
    scale = 1.0 / (levels - 1)
    qmin = -levels / 2
    qmax = levels / 2 - 1
    step = 2.0 * max_val * scale
    xq = jnp.round(x / step)
    xq = jnp.clip(xq, qmin, qmax)
    return xq * step


if __name__ == "__main__":
    num_bits = 8

    # Test 1: small NCHW conv-style activation; size (2048) is a multiple of
    # 1024 -> no padding, no output slice.
    x = jax.random.normal(jax.random.PRNGKey(0), (2, 4, 16, 16), dtype=jnp.float32)
    max_val = jnp.max(jnp.abs(x))                    # per-tensor abs-max, on device
    out = jax.block_until_ready(quant_symmetric(x, max_val, num_bits))
    ref = quant_symmetric_ref(x, max_val, num_bits)
    assert out.shape == x.shape and out.dtype == x.dtype
    assert jnp.allclose(out, ref, atol=1e-6, rtol=1e-6), "mismatch vs reference (test 1)"

    # Test 2: awkward size (not a multiple of 1024) -> exercises the minimal
    # (8,128)-granularity padding + slice-back path.
    x2 = jax.random.normal(jax.random.PRNGKey(0), (2, 3, 17, 19), dtype=jnp.float32)
    max2 = jnp.max(jnp.abs(x2))
    out2 = jax.block_until_ready(quant_symmetric(x2, max2, num_bits))
    ref2 = quant_symmetric_ref(x2, max2, num_bits)
    assert out2.shape == x2.shape
    assert jnp.allclose(out2, ref2, atol=1e-6, rtol=1e-6), "mismatch vs reference (test 2)"

    # Test 3: larger slab with a small tile override -> grid > 1, tiled
    # double-buffered pipeline path (rows divides tile_m exactly).
    x3 = jax.random.normal(jax.random.PRNGKey(0), (4, 8, 32, 32), dtype=jnp.float32)
    max3 = jnp.max(jnp.abs(x3))
    out3 = jax.block_until_ready(quant_symmetric(x3, max3, num_bits, tile_m=128))
    ref3 = quant_symmetric_ref(x3, max3, num_bits)
    assert jnp.allclose(out3, ref3, atol=1e-6, rtol=1e-6), "mismatch vs reference (test 3)"

    # Test 4: rows (24) NOT a multiple of tile_m (16) -> exercises the ragged
    # final block (OOB reads padded, OOB writes masked), 4-bit quantization.
    x4 = jax.random.normal(jax.random.PRNGKey(0), (3, 8, 128), dtype=jnp.float32)
    max4 = jnp.max(jnp.abs(x4))
    out4 = jax.block_until_ready(quant_symmetric(x4, max4, 4, tile_m=16))
    ref4 = quant_symmetric_ref(x4, max4, 4)
    assert jnp.allclose(out4, ref4, atol=1e-6, rtol=1e-6), "mismatch vs reference (test 4)"

    print("KERNEL_OK")
</pallas_src>

<mosaic_0001>
module attributes {stable_mosaic.version = 11 : i64} {
  func.func @_quant_symmetric_kernel(%arg0: i32, %arg1: memref<1xf32, #tpu.memory_space<smem>>, %arg2: memref<16x128xf32, #tpu.memory_space<vmem>>, %arg3: memref<16x128xf32, #tpu.memory_space<vmem>>) attributes {dimension_semantics = [#tpu.dimension_semantics<parallel>], iteration_bounds = array<i64: 1>, scalar_prefetch = 1 : i64, scratch_operands = 0 : i64, tpu.core_type = #tpu.core_type<tc>, window_params = [{transform_indices = @transform_0, window_bounds = array<i64: 16, 128>}, {transform_indices = @transform_1, window_bounds = array<i64: 16, 128>}]} {
    %c0 = arith.constant 0 : index
    %0 = memref.load %arg1[%c0] : memref<1xf32, #tpu.memory_space<smem>>
    %cst = arith.constant 2.000000e+00 : f32
    %1 = arith.mulf %cst, %0 : f32
    %cst_0 = arith.constant 0.00392156886 : f32
    %2 = arith.mulf %1, %cst_0 : f32
    %c0_1 = arith.constant 0 : index
    %c0_2 = arith.constant 0 : index
    %3 = vector.load %arg2[%c0_1, %c0_2] : memref<16x128xf32, #tpu.memory_space<vmem>>, vector<16x128xf32>
    %4 = vector.broadcast %2 : f32 to vector<16x128xf32>
    %5 = arith.divf %3, %4 : vector<16x128xf32>
    %6 = math.roundeven %5 : vector<16x128xf32>
    %cst_3 = arith.constant -1.280000e+02 : f32
    %cst_4 = arith.constant 1.270000e+02 : f32
    %7 = vector.broadcast %cst_3 : f32 to vector<16x128xf32>
    %8 = arith.maximumf %7, %6 : vector<16x128xf32>
    %9 = vector.broadcast %cst_4 : f32 to vector<16x128xf32>
    %10 = arith.minimumf %9, %8 : vector<16x128xf32>
    %11 = vector.broadcast %2 : f32 to vector<16x128xf32>
    %12 = arith.mulf %10, %11 : vector<16x128xf32>
    %c0_5 = arith.constant 0 : index
    %c0_6 = arith.constant 0 : index
    %13 = vector.load %arg3[%c0_5, %c0_6] : memref<16x128xf32, #tpu.memory_space<vmem>>, vector<16x128xf32>
    tpu.vector_store %arg3[%c0_5, %c0_6], %12 {strides = array<i32>} : memref<16x128xf32, #tpu.memory_space<vmem>>, vector<16x128xf32>,
    return
  }
  func.func @transform_0(%arg0: i32, %arg1: memref<1xf32, #tpu.memory_space<smem>>) -> (i32, i32) {
    %c0_i32 = arith.constant 0 : i32
    %c0_i32_0 = arith.constant 0 : i32
    return %arg0, %c0_i32 : i32, i32
  }
  func.func @transform_1(%arg0: i32, %arg1: memref<1xf32, #tpu.memory_space<smem>>) -> (i32, i32) {
    %c0_i32 = arith.constant 0 : i32
    %c0_i32_0 = arith.constant 0 : i32
    return %arg0, %c0_i32 : i32, i32
  }
}

</mosaic_0001>

<bundles_post_ra>
// kernel: tpu_custom_call.1
= control target key start
LH: loop header
LB: loop body
LE: loop exit
PB: predicated region body
PF: predicated region fallthrough
CT: control target
= control target key end

     0   :  { %8 = vsyncpa [#allocation5], 0  ;;  %s186_s0 = inlined_call_operand.<no memory space> [shape: f32[1], index: 0, kind: input, shape index: {}]   ;;  %s187_s1 = inlined_call_operand.hbm [shape: f32[16,128], index: 1, kind: input, shape index: {}]   ;;  %s188_s2 = inlined_call_operand.hbm [shape: f32[16,128], index: 2, kind: output, shape index: {}]  }
   0x1   :  { %9 = vsyncpa [#allocation6], 0  ;;  %s14_s11 = sshll.u32 %s187_s1, 4  ;;  %s152_s12 = smov [#allocation4]   ;;  %s15_s11 = int_to_ptr.hbm [resolvable:$true] %s14_s11 }
   0x2   :  { %s16_s13 = sshll.u32 %s152_s12, 4  ;;  %s153_s14 = smov 128   ;;  %s17_s13 = int_to_ptr.vmem [resolvable:$true] %s16_s13 }
   0x3   :  { %s154_s15 = smov 8  }
   0x4   :  { %22 = dma.hbm_to_vmem [thread:$0]  %s15_s11, 256, %s17_s13, [#allocation5], %s153_s14, %s153_s14, %s154_s15  }
   0x5   :  { %148 = dma.done.wait [#allocation5], 256  }
   0x6   :  { %149 = vsyncadd [#allocation5], 4294967040  ;;  %s28_s18 = smul.f32 2.0, %s186_s0  ;;  %v30_v9 = vld [vmem:[#allocation4] sm:$0xff]  ;;  %v31_v10 = vld [vmem:[#allocation4 + $0x8] sm:$0xff]  ;;  %s155_s0 = smov [#allocation7]  }
   0x7   :  { %s63_s1 = sshll.u32 %s155_s0, 4  ;;  %s65_s22 = sshll.u32 %s188_s2, 4  ;;  %s64_s1 = int_to_ptr.vmem [resolvable:$true] %s63_s1  ;;  %s66_s22 = int_to_ptr.hbm [resolvable:$true] %s65_s22 }
   0x8   :  { %s29_s19 = smul.f32 0.003921569, %s28_s18 }
   0xa   :  { %v32_v0 = vstv %s29_s19 }
   0xb   :  { %98 = vrcp.f32 %v32_v0  ;;  %v44_v3 = vand.u32 2147483648, %v32_v0  ;;  %vm38_vm0 = vweird.f32 %v32_v0  ;;  %v42_v5 = vand.u32 2147483647, %v32_v0 }
   0xd   :  { %v45_v7 = vor.u32 1.1754944e-38, %v44_v3  ;;  %vm43_vm3 = vcmp.eq.f32.partialorder %v42_v5, 8.507059e+37 }
  0x11   :  { %v99_v1 = vpop.eup %98 }
  0x12   :  { %v34_v2 = vmul.f32 %v99_v1, %v32_v0  ;;  %vm39_vm1 = vweird.f32 %v99_v1 }
  0x13   :  { %vm40_vm2 = vmor %vm38_vm0, %vm39_vm1 }
  0x14   :  { %v35_v4 = vsub.f32 1.0, %v34_v2 }
  0x16   :  { %v36_v6 = vmul.f32 %v99_v1, %v35_v4 }
  0x18   :  { %v37_v8 = vadd.f32 %v99_v1, %v36_v6 }
  0x1a   :  { %v41_v11 = vsel %vm40_vm2, %v99_v1, %v37_v8 }
  0x1b   :  { %v46_v12 = vsel %vm43_vm3, %v45_v7, %v41_v11 }
  0x1c   :  { %v47_v13 = vmul.f32 %v46_v12, %v30_v9  ;;  %v48_v14 = vmul.f32 %v46_v12, %v31_v10 }
  0x1e   :  { %v80_v15 = vcvt.f32.s32 %v47_v13  ;;  %v78_v16 = vand.u32 2147483647, %v47_v13  ;;  %v88_v17 = vcvt.f32.s32 %v48_v14  ;;  %v83_v19 = vand.u32 2147483648, %v47_v13 }
  0x1f   :  { %v86_v20 = vand.u32 2147483647, %v48_v14  ;;  %v91_v22 = vand.u32 2147483648, %v48_v14 }
  0x20   :  { %v81_v18 = vcvt.s32.f32 %v80_v15  ;;  %v89_v21 = vcvt.s32.f32 %v88_v17  ;;  %vm79_vm4 = vcmp.lt.f32.partialorder %v78_v16, 8388608.0 }
  0x21   :  { %vm87_vm5 = vcmp.lt.f32.partialorder %v86_v20, 8388608.0 }
  0x22   :  { %v82_v23 = vand.u32 2147483647, %v81_v18  ;;  %v90_v24 = vand.u32 2147483647, %v89_v21 }
  0x24   :  { %v84_v25 = vor.u32 %v83_v19, %v82_v23  ;;  %v92_v26 = vor.u32 %v91_v22, %v90_v24 }
  0x26   :  { %v85_v27 = vsel %vm79_vm4, %v84_v25, %v47_v13  ;;  %v93_v29 = vsel %vm87_vm5, %v92_v26, %v48_v14 }
  0x27   :  { %v51_v28 = vmax.f32 %v85_v27, -128.0  ;;  %v52_v30 = vmax.f32 %v93_v29, -128.0 }
  0x29   :  { %v53_v31 = vmin.f32 %v51_v28, 127.0  ;;  %v54_v32 = vmin.f32 %v52_v30, 127.0 }
  0x2b   :  { %v55_v33 = vmul.f32 %v53_v31, %v32_v0  ;;  %v56_v34 = vmul.f32 %v54_v32, %v32_v0 }
  0x2d   :  { %57 = vst [vmem:[#allocation7] sm:$0xff] %v55_v33 }
  0x2e   :  { %58 = vst [vmem:[#allocation7 + $0x8] sm:$0xff] %v56_v34 }
  0x2f   :  { %71 = dma.vmem_to_hbm [thread:$0]  %s64_s1, 256, %s66_s22, [#allocation6], %s153_s14, %s153_s14, %s154_s15  }
  0x30   :  { %150 = dma.done.wait [#allocation6], 256  }
  0x31   :  { %151 = vsyncadd [#allocation6], 4294967040 }
  0x32   :  { %76 = vsyncpa [#allocation5], 1 }
  0x33   :  { %77 = vsyncpa [#allocation6], 1 }

</bundles_post_ra>
